<compile_context>
chip_gen: v7x
topology: tpu7x:2x2x1
jax: 0.10.0
libtpu: 0.0.40
codegen_flags: <defaults>
</compile_context>

<pallas_src>
import jax
import jax.numpy as jnp
from jax.experimental import pallas as pl
from jax.experimental.pallas import tpu as pltpu

BN_EPS = 1e-5


# --------------------------------------------------------------------------- #
# Kernel
# --------------------------------------------------------------------------- #
def coord_att_kernel(x_ref, w1_ref, b1_ref, wh_ref, bh_ref, ww_ref, bw_ref,
                     ph_ref, pw_ref, eh_ref, ew_ref, o_ref):
    cdt = w1_ref.dtype                       # MXU operand dtype (bf16 default)
    x = x_ref[...]                           # (TN*C, HWp), lane-dense, io dtype
    xc = x.astype(cdt)

    # --- coordinate pools (AdaptiveAvgPool2d) as MXU matmuls, f32 accumulate ---
    xh = jnp.dot(xc, ph_ref[...], preferred_element_type=jnp.float32)   # (TN*C, H)
    xw = jnp.dot(xc, pw_ref[...], preferred_element_type=jnp.float32)   # (TN*C, W)

    # --- conv1 (1x1) with BatchNorm folded; fused over TN images (block-diag W) ---
    yh = jnp.dot(w1_ref[...], xh.astype(cdt),
                 preferred_element_type=jnp.float32) + b1_ref[...]      # (TN*mip, H)
    yw = jnp.dot(w1_ref[...], xw.astype(cdt),
                 preferred_element_type=jnp.float32) + b1_ref[...]      # (TN*mip, W)

    # --- h_swish: y * relu6(y + 3) / 6 (f32 on the VPU; v5e has no bf16 VALU) ---
    yh = yh * jnp.clip(yh + 3.0, 0.0, 6.0) * (1.0 / 6.0)
    yw = yw * jnp.clip(yw + 3.0, 0.0, 6.0) * (1.0 / 6.0)

    # --- attention 1x1 convs + sigmoid (separate h / w branches, no concat/split) ---
    ah = jax.nn.sigmoid(
        jnp.dot(wh_ref[...], yh.astype(cdt),
                preferred_element_type=jnp.float32) + bh_ref[...])      # (TN*C, H)
    aw = jax.nn.sigmoid(
        jnp.dot(ww_ref[...], yw.astype(cdt),
                preferred_element_type=jnp.float32) + bw_ref[...])      # (TN*C, W)

    # --- broadcast the gates back to dense HWp lanes via MXU, then gate in f32 ---
    gh = jnp.dot(ah.astype(cdt), eh_ref[...], preferred_element_type=jnp.float32)
    gw = jnp.dot(aw.astype(cdt), ew_ref[...], preferred_element_type=jnp.float32)
    o_ref[...] = (x.astype(jnp.float32) * gh * gw).astype(o_ref.dtype)


# --------------------------------------------------------------------------- #
# Host-side helpers
# --------------------------------------------------------------------------- #
def _vmem_budgets():
    """(x-tile element budget, scoped vmem limit) per TPU generation.
    v7x has 64 MiB VMEM/TC -> smaller tiles; v5e/v6e have 128 MiB."""
    try:
        phys = int(pltpu.get_tpu_info().vmem_capacity_bytes)
    except Exception:
        phys = 128 << 20
    if phys <= (64 << 20):                       # v7x-class
        return (5 << 20) // 4, 48 << 20          # ~1.25M elems, 48 MiB limit
    return (8 << 20) // 4, 64 << 20              # ~2M elems,   64 MiB limit


def _num_tensorcores():
    try:
        kind = jax.devices()[0].device_kind.lower()
        if "v7" in kind or "7x" in kind:
            return 2
    except Exception:
        pass
    return 1


def _pick_tn(n, c, hw_pad, target_elems, max_fused_rows, prefer_even_steps):
    """Images per grid step: legal sublane extent ((tn*C)%8==0 or full array),
    element budget, tn*C cap (kron weights scale ~tn^2), and on multi-TC chips
    prefer an even number of grid steps so the parallel axis splits evenly."""
    valid = [d for d in range(1, n + 1)
             if n % d == 0 and ((d * c) % 8 == 0 or d == n)]
    capped = [d for d in valid if d * c <= max_fused_rows] or [min(valid)]
    per_img = c * hw_pad
    prefs = ([(2, True), (2, False), (1, False)] if prefer_even_steps
             else [(2, False), (1, False)])
    for min_steps, want_even in prefs:
        fits = [d for d in capped
                if d * per_img <= target_elems
                and n // d >= min_steps
                and (not want_even or (n // d) % 2 == 0)]
        if fits:
            return max(fits)
    # Fallback: smallest legal tile; the wrapper bumps vmem_limit to cover it.
    return min(capped)


_POOL_CACHE = {}


def _pool_expand_consts(H, W, HWp, matmul_dtype):
    """Value-independent pooling / gate-expansion matrices, cached per shape."""
    key = (H, W, HWp, jnp.dtype(matmul_dtype).name)
    hit = _POOL_CACHE.get(key)
    if hit is not None:
        return hit
    HW = H * W
    ph = jnp.repeat(jnp.eye(H, dtype=jnp.float32), W, axis=0) / W      # (HW, H)
    pw = jnp.tile(jnp.eye(W, dtype=jnp.float32), (H, 1)) / H           # (HW, W)
    eh = jnp.repeat(jnp.eye(H, dtype=jnp.float32), W, axis=1)          # (H, HW)
    ew = jnp.tile(jnp.eye(W, dtype=jnp.float32), (1, H))               # (W, HW)
    if HWp != HW:   # zero-pad spatial lanes: padded lanes never pooled / gated
        ph = jnp.pad(ph, ((0, HWp - HW), (0, 0)))
        pw = jnp.pad(pw, ((0, HWp - HW), (0, 0)))
        eh = jnp.pad(eh, ((0, 0), (0, HWp - HW)))
        ew = jnp.pad(ew, ((0, 0), (0, HWp - HW)))
    consts = tuple(a.astype(matmul_dtype) for a in (ph, pw, eh, ew))
    _POOL_CACHE[key] = consts
    return consts


# --------------------------------------------------------------------------- #
# Wrapper
# --------------------------------------------------------------------------- #
def coord_att(x, params, *, matmul_dtype=jnp.bfloat16, io_dtype=jnp.bfloat16,
              out_dtype=None, tile_target_elems=None, vmem_limit_bytes=None,
              max_fused_rows=2048):
    N, C, H, W = x.shape
    HW = H * W
    HWp = ((HW + 127) // 128) * 128            # lane-dense last axis
    mip = params["w1"].shape[0]
    oup = params["wh"].shape[0]
    assert oup == C, "gating `identity * a_w * a_h` requires oup == C"
    out_dtype = io_dtype if out_dtype is None else out_dtype

    default_elems, default_vmem = _vmem_budgets()
    if tile_target_elems is None:
        tile_target_elems = default_elems
    if vmem_limit_bytes is None:
        vmem_limit_bytes = default_vmem

    # ---- fold BatchNorm (inference, running stats) into conv1 ----
    scale = params["gamma"] * jax.lax.rsqrt(params["var"] + BN_EPS)      # (mip, 1)
    w1f = scale * params["w1"]                                            # (mip, C)
    b1f = scale * (params["b1"] - params["mean"]) + params["beta"]        # (mip, 1)

    # ---- tile choice: TN images per grid step, (TN*C, HWp) lane-dense block ----
    tn = _pick_tn(N, C, HWp, tile_target_elems, max_fused_rows,
                  _num_tensorcores() >= 2)
    grid = (N // tn,)

    # ---- fuse the TN tiny 1x1-conv matmuls into single matmuls (block-diag) ----
    eye_tn = jnp.eye(tn, dtype=jnp.float32)
    w1k = jnp.kron(eye_tn, w1f).astype(matmul_dtype)                      # (tn*mip, tn*C)
    b1k = jnp.tile(b1f, (tn, 1)).astype(jnp.float32)                      # (tn*mip, 1)
    whk = jnp.kron(eye_tn, params["wh"]).astype(matmul_dtype)             # (tn*C, tn*mip)
    bhk = jnp.tile(params["bh"], (tn, 1)).astype(jnp.float32)             # (tn*C, 1)
    wwk = jnp.kron(eye_tn, params["ww"]).astype(matmul_dtype)             # (tn*C, tn*mip)
    bwk = jnp.tile(params["bw"], (tn, 1)).astype(jnp.float32)             # (tn*C, 1)

    ph, pw, eh, ew = _pool_expand_consts(H, W, HWp, matmul_dtype)

    x2 = x.reshape(N * C, HW).astype(io_dtype)   # bf16 I/O halves HBM traffic
    if HWp != HW:
        x2 = jnp.pad(x2, ((0, 0), (0, HWp - HW)))

    param_list = [w1k, b1k, whk, bhk, wwk, bwk, ph, pw, eh, ew]

    # ---- working-set estimate: 2x in + 2x out (double-buffered) + f32 temps ----
    tile_elems = tn * C * HWp
    est = (2 * tile_elems * jnp.dtype(io_dtype).itemsize
           + 2 * tile_elems * jnp.dtype(out_dtype).itemsize
           + 3 * tile_elems * 4
           + 2 * sum(a.size * a.dtype.itemsize for a in param_list))
    vmem_limit_bytes = max(vmem_limit_bytes, int(est * 1.25))

    def const_spec(arr):
        return pl.BlockSpec(arr.shape, lambda n, _r=arr.ndim: (0,) * _r)

    out2 = pl.pallas_call(
        coord_att_kernel,
        out_shape=jax.ShapeDtypeStruct((N * C, HWp), out_dtype),
        grid=grid,
        in_specs=[pl.BlockSpec((tn * C, HWp), lambda n: (n, 0))]
                 + [const_spec(a) for a in param_list],
        out_specs=pl.BlockSpec((tn * C, HWp), lambda n: (n, 0)),
        compiler_params=pltpu.CompilerParams(
            dimension_semantics=("parallel",),
            vmem_limit_bytes=vmem_limit_bytes,
        ),
    )(x2, *param_list)

    if HWp != HW:
        out2 = out2[:, :HW]
    return out2.reshape(N, C, H, W)


# --------------------------------------------------------------------------- #
# Synthetic params + pure-JAX reference
# --------------------------------------------------------------------------- #
def make_params(key, inp, oup, reduction=32):
    """Deterministic synthetic parameters matching CoordAtt.__init__ shapes."""
    mip = max(8, inp // reduction)
    ks = jax.random.split(key, 6)

    def conv_init(kw, kb, out_c, in_c):
        bound = 1.0 / jnp.sqrt(in_c)
        w = jax.random.uniform(kw, (out_c, in_c), jnp.float32, -bound, bound)
        b = jax.random.uniform(kb, (out_c, 1), jnp.float32, -bound, bound)
        return w, b

    w1, b1 = conv_init(ks[0], ks[1], mip, inp)
    wh, bh = conv_init(ks[2], ks[3], oup, mip)
    ww, bw = conv_init(ks[4], ks[5], oup, mip)
    return {
        "w1": w1, "b1": b1,
        # BatchNorm2d defaults: gamma=1, beta=0, running_mean=0, running_var=1
        "gamma": jnp.ones((mip, 1), jnp.float32),
        "beta": jnp.zeros((mip, 1), jnp.float32),
        "mean": jnp.zeros((mip, 1), jnp.float32),
        "var": jnp.ones((mip, 1), jnp.float32),
        "wh": wh, "bh": bh,
        "ww": ww, "bw": bw,
    }


def coord_att_ref(x, p):
    """Pure-JAX reference (mirrors the PyTorch forward, inference-mode BN)."""
    N, C, H, W = x.shape
    x_h = jnp.mean(x, axis=3)                              # (N, C, H)
    x_w = jnp.mean(x, axis=2)                              # (N, C, W)
    y = jnp.concatenate([x_h, x_w], axis=2)                # (N, C, H+W)
    y = jnp.einsum("mc,ncl->nml", p["w1"], y) + p["b1"][None]
    scale = p["gamma"] / jnp.sqrt(p["var"] + BN_EPS)
    y = (y - p["mean"][None]) * scale[None] + p["beta"][None]
    y = y * jnp.clip(y + 3.0, 0.0, 6.0) / 6.0
    yh, yw = y[:, :, :H], y[:, :, H:]
    a_h = jax.nn.sigmoid(jnp.einsum("om,nml->nol", p["wh"], yh) + p["bh"][None])
    a_w = jax.nn.sigmoid(jnp.einsum("om,nml->nol", p["ww"], yw) + p["bw"][None])
    return x * a_h[:, :, :, None] * a_w[:, :, None, :]


# --------------------------------------------------------------------------- #
# Self-test
# --------------------------------------------------------------------------- #
if __name__ == "__main__":
    N, C, H, W = 2, 4, 16, 16          # inp = oup = 4, mip = max(8, 4//32) = 8
    key = jax.random.PRNGKey(0)
    kx, kp = jax.random.split(key)
    x = jax.random.normal(kx, (N, C, H, W), jnp.float32)
    params = make_params(kp, inp=C, oup=C, reduction=32)

    ref = coord_att_ref(x, params)

    # 1) exact-grade check with f32 everywhere (algorithmic correctness)
    out_f32 = coord_att(x, params, matmul_dtype=jnp.float32,
                        io_dtype=jnp.float32, out_dtype=jnp.float32)
    out_f32 = jax.block_until_ready(out_f32)
    assert out_f32.shape == ref.shape == (N, C, H, W)
    assert jnp.allclose(out_f32, ref, rtol=2e-5, atol=2e-5), "f32 mismatch vs reference"

    # 2) performance defaults: bf16 I/O + bf16 MXU operands, f32 accumulation
    out = jax.block_until_ready(coord_att(x, params))
    assert out.shape == (N, C, H, W)
    assert out.dtype == jnp.bfloat16
    assert jnp.allclose(out.astype(jnp.float32), ref, rtol=5e-2, atol=5e-2), \
        "bf16 mismatch vs reference"

    print("KERNEL_OK")
</pallas_src>

<mosaic_0001>
module attributes {stable_mosaic.version = 11 : i64} {
  func.func @coord_att_kernel(%arg0: i32, %arg1: memref<8x256xf32, #tpu.memory_space<vmem>>, %arg2: memref<16x8xf32, #tpu.memory_space<vmem>>, %arg3: memref<16x1xf32, #tpu.memory_space<vmem>>, %arg4: memref<8x16xf32, #tpu.memory_space<vmem>>, %arg5: memref<8x1xf32, #tpu.memory_space<vmem>>, %arg6: memref<8x16xf32, #tpu.memory_space<vmem>>, %arg7: memref<8x1xf32, #tpu.memory_space<vmem>>, %arg8: memref<256x16xf32, #tpu.memory_space<vmem>>, %arg9: memref<256x16xf32, #tpu.memory_space<vmem>>, %arg10: memref<16x256xf32, #tpu.memory_space<vmem>>, %arg11: memref<16x256xf32, #tpu.memory_space<vmem>>, %arg12: memref<8x256xf32, #tpu.memory_space<vmem>>) attributes {dimension_semantics = [#tpu.dimension_semantics<parallel>], iteration_bounds = array<i64: 1>, scalar_prefetch = 0 : i64, scratch_operands = 0 : i64, tpu.core_type = #tpu.core_type<tc>, window_params = [{transform_indices = @transform_0, window_bounds = array<i64: 8, 256>}, {pipeline_mode = #tpu.pipeline_mode<synchronous>, transform_indices = @transform_1, window_bounds = array<i64: 16, 8>}, {pipeline_mode = #tpu.pipeline_mode<synchronous>, transform_indices = @transform_2, window_bounds = array<i64: 16, 1>}, {pipeline_mode = #tpu.pipeline_mode<synchronous>, transform_indices = @transform_3, window_bounds = array<i64: 8, 16>}, {pipeline_mode = #tpu.pipeline_mode<synchronous>, transform_indices = @transform_4, window_bounds = array<i64: 8, 1>}, {pipeline_mode = #tpu.pipeline_mode<synchronous>, transform_indices = @transform_5, window_bounds = array<i64: 8, 16>}, {pipeline_mode = #tpu.pipeline_mode<synchronous>, transform_indices = @transform_6, window_bounds = array<i64: 8, 1>}, {pipeline_mode = #tpu.pipeline_mode<synchronous>, transform_indices = @transform_7, window_bounds = array<i64: 256, 16>}, {pipeline_mode = #tpu.pipeline_mode<synchronous>, transform_indices = @transform_8, window_bounds = array<i64: 256, 16>}, {pipeline_mode = #tpu.pipeline_mode<synchronous>, transform_indices = @transform_9, window_bounds = array<i64: 16, 256>}, {pipeline_mode = #tpu.pipeline_mode<synchronous>, transform_indices = @transform_10, window_bounds = array<i64: 16, 256>}, {transform_indices = @transform_11, window_bounds = array<i64: 8, 256>}]} {
    %c0 = arith.constant 0 : index
    %c0_0 = arith.constant 0 : index
    %0 = vector.load %arg1[%c0, %c0_0] : memref<8x256xf32, #tpu.memory_space<vmem>>, vector<8x256xf32>
    %c0_1 = arith.constant 0 : index
    %c0_2 = arith.constant 0 : index
    %1 = vector.load %arg8[%c0_1, %c0_2] : memref<256x16xf32, #tpu.memory_space<vmem>>, vector<256x16xf32>
    %cst = arith.constant dense<0.000000e+00> : vector<8x16xf32>
    %2 = tpu.matmul %0, %1, %cst {dimension_numbers = #tpu.dot_dimension_numbers<[1], [0], [0], [1], [0, 0, 1, 1], [], []>} : vector<8x256xf32>, vector<256x16xf32>, vector<8x16xf32> -> vector<8x16xf32>
    %c0_3 = arith.constant 0 : index
    %c0_4 = arith.constant 0 : index
    %3 = vector.load %arg9[%c0_3, %c0_4] : memref<256x16xf32, #tpu.memory_space<vmem>>, vector<256x16xf32>
    %cst_5 = arith.constant dense<0.000000e+00> : vector<8x16xf32>
    %4 = tpu.matmul %0, %3, %cst_5 {dimension_numbers = #tpu.dot_dimension_numbers<[1], [0], [0], [1], [0, 0, 1, 1], [], []>} : vector<8x256xf32>, vector<256x16xf32>, vector<8x16xf32> -> vector<8x16xf32>
    %c0_6 = arith.constant 0 : index
    %c0_7 = arith.constant 0 : index
    %5 = vector.load %arg2[%c0_6, %c0_7] : memref<16x8xf32, #tpu.memory_space<vmem>>, vector<16x8xf32>
    %cst_8 = arith.constant dense<0.000000e+00> : vector<16x16xf32>
    %6 = tpu.matmul %5, %2, %cst_8 {dimension_numbers = #tpu.dot_dimension_numbers<[1], [0], [0], [1], [0, 0, 1, 1], [], []>} : vector<16x8xf32>, vector<8x16xf32>, vector<16x16xf32> -> vector<16x16xf32>
    %c0_9 = arith.constant 0 : index
    %c0_10 = arith.constant 0 : index
    %7 = vector.load %arg3[%c0_9, %c0_10] : memref<16x1xf32, #tpu.memory_space<vmem>>, vector<16x1xf32>
    %8 = vector.broadcast %7 : vector<16x1xf32> to vector<16x16xf32>
    %9 = arith.addf %6, %8 : vector<16x16xf32>
    %c0_11 = arith.constant 0 : index
    %c0_12 = arith.constant 0 : index
    %10 = vector.load %arg2[%c0_11, %c0_12] : memref<16x8xf32, #tpu.memory_space<vmem>>, vector<16x8xf32>
    %cst_13 = arith.constant dense<0.000000e+00> : vector<16x16xf32>
    %11 = tpu.matmul %10, %4, %cst_13 {dimension_numbers = #tpu.dot_dimension_numbers<[1], [0], [0], [1], [0, 0, 1, 1], [], []>} : vector<16x8xf32>, vector<8x16xf32>, vector<16x16xf32> -> vector<16x16xf32>
    %c0_14 = arith.constant 0 : index
    %c0_15 = arith.constant 0 : index
    %12 = vector.load %arg3[%c0_14, %c0_15] : memref<16x1xf32, #tpu.memory_space<vmem>>, vector<16x1xf32>
    %13 = vector.broadcast %12 : vector<16x1xf32> to vector<16x16xf32>
    %14 = arith.addf %11, %13 : vector<16x16xf32>
    %cst_16 = arith.constant 3.000000e+00 : f32
    %15 = vector.broadcast %cst_16 : f32 to vector<16x16xf32>
    %16 = arith.addf %9, %15 : vector<16x16xf32>
    %cst_17 = arith.constant 0.000000e+00 : f32
    %cst_18 = arith.constant 6.000000e+00 : f32
    %17 = vector.broadcast %cst_17 : f32 to vector<16x16xf32>
    %18 = arith.maximumf %17, %16 : vector<16x16xf32>
    %19 = vector.broadcast %cst_18 : f32 to vector<16x16xf32>
    %20 = arith.minimumf %19, %18 : vector<16x16xf32>
    %21 = arith.mulf %9, %20 : vector<16x16xf32>
    %cst_19 = arith.constant 0.166666672 : f32
    %22 = vector.broadcast %cst_19 : f32 to vector<16x16xf32>
    %23 = arith.mulf %21, %22 : vector<16x16xf32>
    %cst_20 = arith.constant 3.000000e+00 : f32
    %24 = vector.broadcast %cst_20 : f32 to vector<16x16xf32>
    %25 = arith.addf %14, %24 : vector<16x16xf32>
    %cst_21 = arith.constant 0.000000e+00 : f32
    %cst_22 = arith.constant 6.000000e+00 : f32
    %26 = vector.broadcast %cst_21 : f32 to vector<16x16xf32>
    %27 = arith.maximumf %26, %25 : vector<16x16xf32>
    %28 = vector.broadcast %cst_22 : f32 to vector<16x16xf32>
    %29 = arith.minimumf %28, %27 : vector<16x16xf32>
    %30 = arith.mulf %14, %29 : vector<16x16xf32>
    %cst_23 = arith.constant 0.166666672 : f32
    %31 = vector.broadcast %cst_23 : f32 to vector<16x16xf32>
    %32 = arith.mulf %30, %31 : vector<16x16xf32>
    %c0_24 = arith.constant 0 : index
    %c0_25 = arith.constant 0 : index
    %33 = vector.load %arg4[%c0_24, %c0_25] : memref<8x16xf32, #tpu.memory_space<vmem>>, vector<8x16xf32>
    %cst_26 = arith.constant dense<0.000000e+00> : vector<8x16xf32>
    %34 = tpu.matmul %33, %23, %cst_26 {dimension_numbers = #tpu.dot_dimension_numbers<[1], [0], [0], [1], [0, 0, 1, 1], [], []>} : vector<8x16xf32>, vector<16x16xf32>, vector<8x16xf32> -> vector<8x16xf32>
    %c0_27 = arith.constant 0 : index
    %c0_28 = arith.constant 0 : index
    %35 = vector.load %arg5[%c0_27, %c0_28] : memref<8x1xf32, #tpu.memory_space<vmem>>, vector<8x1xf32>
    %36 = vector.broadcast %35 : vector<8x1xf32> to vector<8x16xf32>
    %37 = arith.addf %34, %36 : vector<8x16xf32>
    %38 = arith.negf %37 : vector<8x16xf32>
    %39 = math.exp %38 : vector<8x16xf32>
    %cst_29 = arith.constant 1.000000e+00 : f32
    %40 = vector.broadcast %cst_29 : f32 to vector<8x16xf32>
    %41 = arith.addf %40, %39 : vector<8x16xf32>
    %42 = arith.divf %40, %41 : vector<8x16xf32>
    %c0_30 = arith.constant 0 : index
    %c0_31 = arith.constant 0 : index
    %43 = vector.load %arg6[%c0_30, %c0_31] : memref<8x16xf32, #tpu.memory_space<vmem>>, vector<8x16xf32>
    %cst_32 = arith.constant dense<0.000000e+00> : vector<8x16xf32>
    %44 = tpu.matmul %43, %32, %cst_32 {dimension_numbers = #tpu.dot_dimension_numbers<[1], [0], [0], [1], [0, 0, 1, 1], [], []>} : vector<8x16xf32>, vector<16x16xf32>, vector<8x16xf32> -> vector<8x16xf32>
    %c0_33 = arith.constant 0 : index
    %c0_34 = arith.constant 0 : index
    %45 = vector.load %arg7[%c0_33, %c0_34] : memref<8x1xf32, #tpu.memory_space<vmem>>, vector<8x1xf32>
    %46 = vector.broadcast %45 : vector<8x1xf32> to vector<8x16xf32>
    %47 = arith.addf %44, %46 : vector<8x16xf32>
    %48 = arith.negf %47 : vector<8x16xf32>
    %49 = math.exp %48 : vector<8x16xf32>
    %cst_35 = arith.constant 1.000000e+00 : f32
    %50 = vector.broadcast %cst_35 : f32 to vector<8x16xf32>
    %51 = arith.addf %50, %49 : vector<8x16xf32>
    %52 = arith.divf %50, %51 : vector<8x16xf32>
    %c0_36 = arith.constant 0 : index
    %c0_37 = arith.constant 0 : index
    %53 = vector.load %arg10[%c0_36, %c0_37] : memref<16x256xf32, #tpu.memory_space<vmem>>, vector<16x256xf32>
    %cst_38 = arith.constant dense<0.000000e+00> : vector<8x256xf32>
    %54 = tpu.matmul %42, %53, %cst_38 {dimension_numbers = #tpu.dot_dimension_numbers<[1], [0], [0], [1], [0, 0, 1, 1], [], []>} : vector<8x16xf32>, vector<16x256xf32>, vector<8x256xf32> -> vector<8x256xf32>
    %c0_39 = arith.constant 0 : index
    %c0_40 = arith.constant 0 : index
    %55 = vector.load %arg11[%c0_39, %c0_40] : memref<16x256xf32, #tpu.memory_space<vmem>>, vector<16x256xf32>
    %cst_41 = arith.constant dense<0.000000e+00> : vector<8x256xf32>
    %56 = tpu.matmul %52, %55, %cst_41 {dimension_numbers = #tpu.dot_dimension_numbers<[1], [0], [0], [1], [0, 0, 1, 1], [], []>} : vector<8x16xf32>, vector<16x256xf32>, vector<8x256xf32> -> vector<8x256xf32>
    %57 = arith.mulf %0, %54 : vector<8x256xf32>
    %58 = arith.mulf %57, %56 : vector<8x256xf32>
    %c0_42 = arith.constant 0 : index
    %c0_43 = arith.constant 0 : index
    %59 = vector.load %arg12[%c0_42, %c0_43] : memref<8x256xf32, #tpu.memory_space<vmem>>, vector<8x256xf32>
    tpu.vector_store %arg12[%c0_42, %c0_43], %58 {strides = array<i32>} : memref<8x256xf32, #tpu.memory_space<vmem>>, vector<8x256xf32>,
    return
  }
  func.func @transform_0(%arg0: i32) -> (i32, i32) {
    %c0_i32 = arith.constant 0 : i32
    %c0_i32_0 = arith.constant 0 : i32
    return %arg0, %c0_i32 : i32, i32
  }
  func.func @transform_1(%arg0: i32) -> (i32, i32) {
    %c0_i32 = arith.constant 0 : i32
    %c0_i32_0 = arith.constant 0 : i32
    %c0_i32_1 = arith.constant 0 : i32
    return %c0_i32, %c0_i32_0 : i32, i32
  }
  func.func @transform_2(%arg0: i32) -> (i32, i32) {
    %c0_i32 = arith.constant 0 : i32
    %c0_i32_0 = arith.constant 0 : i32
    %c0_i32_1 = arith.constant 0 : i32
    return %c0_i32, %c0_i32_0 : i32, i32
  }
  func.func @transform_3(%arg0: i32) -> (i32, i32) {
    %c0_i32 = arith.constant 0 : i32
    %c0_i32_0 = arith.constant 0 : i32
    %c0_i32_1 = arith.constant 0 : i32
    return %c0_i32, %c0_i32_0 : i32, i32
  }
  func.func @transform_4(%arg0: i32) -> (i32, i32) {
    %c0_i32 = arith.constant 0 : i32
    %c0_i32_0 = arith.constant 0 : i32
    %c0_i32_1 = arith.constant 0 : i32
    return %c0_i32, %c0_i32_0 : i32, i32
  }
  func.func @transform_5(%arg0: i32) -> (i32, i32) {
    %c0_i32 = arith.constant 0 : i32
    %c0_i32_0 = arith.constant 0 : i32
    %c0_i32_1 = arith.constant 0 : i32
    return %c0_i32, %c0_i32_0 : i32, i32
  }
  func.func @transform_6(%arg0: i32) -> (i32, i32) {
    %c0_i32 = arith.constant 0 : i32
    %c0_i32_0 = arith.constant 0 : i32
    %c0_i32_1 = arith.constant 0 : i32
    return %c0_i32, %c0_i32_0 : i32, i32
  }
  func.func @transform_7(%arg0: i32) -> (i32, i32) {
    %c0_i32 = arith.constant 0 : i32
    %c0_i32_0 = arith.constant 0 : i32
    %c0_i32_1 = arith.constant 0 : i32
    return %c0_i32, %c0_i32_0 : i32, i32
  }
  func.func @transform_8(%arg0: i32) -> (i32, i32) {
    %c0_i32 = arith.constant 0 : i32
    %c0_i32_0 = arith.constant 0 : i32
    %c0_i32_1 = arith.constant 0 : i32
    return %c0_i32, %c0_i32_0 : i32, i32
  }
  func.func @transform_9(%arg0: i32) -> (i32, i32) {
    %c0_i32 = arith.constant 0 : i32
    %c0_i32_0 = arith.constant 0 : i32
    %c0_i32_1 = arith.constant 0 : i32
    return %c0_i32, %c0_i32_0 : i32, i32
  }
  func.func @transform_10(%arg0: i32) -> (i32, i32) {
    %c0_i32 = arith.constant 0 : i32
    %c0_i32_0 = arith.constant 0 : i32
    %c0_i32_1 = arith.constant 0 : i32
    return %c0_i32, %c0_i32_0 : i32, i32
  }
  func.func @transform_11(%arg0: i32) -> (i32, i32) {
    %c0_i32 = arith.constant 0 : i32
    %c0_i32_0 = arith.constant 0 : i32
    return %arg0, %c0_i32 : i32, i32
  }
}

</mosaic_0001>

<bundles_post_ra>
// kernel: tpu_custom_call.1
= control target key start
LH: loop header
LB: loop body
LE: loop exit
PB: predicated region body
PF: predicated region fallthrough
CT: control target
= control target key end

     0   :  { %16 = vsyncpa [#allocation3], 0  ;;  %s1692_s0 = inlined_call_operand.hbm [shape: f32[8,256], index: 0, kind: input, shape index: {}]   ;;  %s1693_s1 = inlined_call_operand.hbm [shape: f32[16,8], index: 1, kind: input, shape index: {}]   ;;  %s1694_s2 = inlined_call_operand.hbm [shape: f32[16,1], index: 2, kind: input, shape index: {}]   ;;  %s1695_s3 = inlined_call_operand.hbm [shape: f32[8,16], index: 3, kind: input, shape index: {}]   ;;  %s1696_s4 = inlined_call_operand.hbm [shape: f32[8,1], index: 4, kind: input, shape index: {}]   ;;  %s1697_s5 = inlined_call_operand.hbm [shape: f32[8,16], index: 5, kind: input, shape index: {}]   ;;  %s1698_s6 = inlined_call_operand.hbm [shape: f32[8,1], index: 6, kind: input, shape index: {}]   ;;  %s1699_s7 = inlined_call_operand.hbm [shape: f32[256,16], index: 7, kind: input, shape index: {}]   ;;  %s1700_s8 = inlined_call_operand.hbm [shape: f32[256,16], index: 8, kind: input, shape index: {}]   ;;  %s1701_s9 = inlined_call_operand.hbm [shape: f32[16,256], index: 9, kind: input, shape index: {}]   ;;  %s1702_s10 = inlined_call_operand.hbm [shape: f32[16,256], index: 10, kind: input, shape index: {}]   ;;  %s1703_s11 = inlined_call_operand.hbm [shape: f32[8,256], index: 11, kind: output, shape index: {}]  }
   0x1   :  { %17 = vsyncpa [#allocation6], 0 }
   0x2   :  { %18 = vsyncpa [#allocation9], 0 }
   0x3   :  { %19 = vsyncpa [#allocation12], 0 }
   0x4   :  { %20 = vsyncpa [#allocation15], 0 }
   0x5   :  { %21 = vsyncpa [#allocation18], 0 }
   0x6   :  { %22 = vsyncpa [#allocation4], 0  ;;  %s1432_s17 = smov [#allocation5]   ;;  %s1154_s21 = scalar_lea.hbm %s1693_s1, 256 }
   0x7   :  { %s38_s18 = sshll.u32 %s1432_s17, 4  ;;  %p1155_p0 = scmp.ne.s32.totalorder %s1693_s1, %s1154_s21  ;;  %s39_s18 = int_to_ptr.vmem [resolvable:$true] %s38_s18 }
   0x8   :  { %p1158_p1 = scmp.lt.u32.totalorder %s1154_s21, %s1693_s1 }
   0xa   :  { %p1160_p2 = pnand %p1158_p1, %p1155_p0 }
   0xc   :  { %1163 = shalt.err (!%p1160_p2)
}
   0xd   :  { %s1164_s26 = scalar_lea.vmem %s39_s18, 256  ;;  %p1169_p4 = scmp.lt.s32.totalorder %s39_s18, %s39_s18 }
   0xe   :  { %p1165_p3 = scmp.ne.s32.totalorder %s39_s18, %s1164_s26  ;;  %p1170_p5 = scmp.lt.s32.totalorder %s1164_s26, %s1164_s26 }
  0x10   :  { %p1171_p6 = por %p1170_p5, %p1169_p4 }
  0x12   :  { %p1172_p7 = pnand %p1171_p6, %p1165_p3 }
  0x14   :  { %1175 = shalt.err (!%p1172_p7)
}
  0x15   :  { %s1433_s27 = smov 128   ;;  %s1434_s28 = smov 8  }
  0x16   :  { %44 = dma.hbm_to_vmem [thread:$0]  %s1693_s1, 256, %s39_s18, [#allocation6], %s1433_s27, %s1433_s27, %s1434_s28  }
  0x17   :  { %s1435_s12 = smov [#allocation8]   ;;  %s1436_s14 = smov [#allocation11]  }
  0x18   :  { %s63_s13 = sshll.u32 %s1435_s12, 4  ;;  %s83_s15 = sshll.u32 %s1436_s14, 4  ;;  %s64_s13 = int_to_ptr.vmem [resolvable:$true] %s63_s13  ;;  %s84_s15 = int_to_ptr.vmem [resolvable:$true] %s83_s15 }
  0x19   :  { %s1176_s19 = scalar_lea.hbm %s1695_s3, 128 }
  0x1a   :  { %p1177_p8 = scmp.ne.s32.totalorder %s1695_s3, %s1176_s19  ;;  %p1180_p9 = scmp.lt.u32.totalorder %s1176_s19, %s1695_s3 }
  0x1c   :  { %p1182_p10 = pnand %p1180_p9, %p1177_p8 }
  0x1e   :  { %1185 = shalt.err (!%p1182_p10)
}
  0x1f   :  { %s1186_s1 = scalar_lea.vmem %s64_s13, 128  ;;  %p1191_p12 = scmp.lt.s32.totalorder %s64_s13, %s64_s13 }
  0x20   :  { %p1187_p11 = scmp.ne.s32.totalorder %s64_s13, %s1186_s1  ;;  %p1192_p13 = scmp.lt.s32.totalorder %s1186_s1, %s1186_s1 }
  0x22   :  { %p1193_p0 = por %p1192_p13, %p1191_p12 }
  0x24   :  { %p1194_p1 = pnand %p1193_p0, %p1187_p11 }
  0x26   :  { %1197 = shalt.err (!%p1194_p1)
}
  0x27   :  { %66 = dma.hbm_to_vmem [thread:$0]  %s1695_s3, 128, %s64_s13, [#allocation9]  }
  0x28   :  { %s1198_s29 = scalar_lea.hbm %s1697_s5, 128 }
  0x29   :  { %p1199_p2 = scmp.ne.s32.totalorder %s1697_s5, %s1198_s29  ;;  %p1202_p3 = scmp.lt.u32.totalorder %s1198_s29, %s1697_s5 }
  0x2b   :  { %p1204_p4 = pnand %p1202_p3, %p1199_p2 }
  0x2d   :  { %1207 = shalt.err (!%p1204_p4)
}
  0x2e   :  { %s1208_s17 = scalar_lea.vmem %s84_s15, 128  ;;  %p1213_p6 = scmp.lt.s32.totalorder %s84_s15, %s84_s15 }
  0x2f   :  { %p1209_p5 = scmp.ne.s32.totalorder %s84_s15, %s1208_s17  ;;  %p1214_p7 = scmp.lt.s32.totalorder %s1208_s17, %s1208_s17 }
  0x31   :  { %p1215_p8 = por %p1214_p7, %p1213_p6 }
  0x33   :  { %p1216_p9 = pnand %p1215_p8, %p1209_p5 }
  0x35   :  { %1219 = shalt.err (!%p1216_p9)
}
  0x36   :  { %86 = dma.hbm_to_vmem [thread:$0]  %s1697_s5, 128, %s84_s15, [#allocation12]  }
  0x37   :  { %s1437_s19 = smov [#allocation14]   ;;  %s1438_s21 = smov [#allocation17]  }
  0x38   :  { %s102_s20 = sshll.u32 %s1437_s19, 4  ;;  %s126_s22 = sshll.u32 %s1438_s21, 4  ;;  %s103_s20 = int_to_ptr.vmem [resolvable:$true] %s102_s20  ;;  %s127_s22 = int_to_ptr.vmem [resolvable:$true] %s126_s22 }
  0x39   :  { %s1220_s18 = scalar_lea.hbm %s1699_s7, 4096 }
  0x3a   :  { %p1221_p10 = scmp.ne.s32.totalorder %s1699_s7, %s1220_s18  ;;  %p1224_p11 = scmp.lt.u32.totalorder %s1220_s18, %s1699_s7 }
  0x3c   :  { %p1226_p12 = pnand %p1224_p11, %p1221_p10 }
  0x3e   :  { %1229 = shalt.err (!%p1226_p12)
}
  0x3f   :  { %s1230_s5 = scalar_lea.vmem %s103_s20, 4096  ;;  %p1235_p0 = scmp.lt.s32.totalorder %s103_s20, %s103_s20 }
  0x40   :  { %p1231_p13 = scmp.ne.s32.totalorder %s103_s20, %s1230_s5  ;;  %p1236_p1 = scmp.lt.s32.totalorder %s1230_s5, %s1230_s5 }
  0x42   :  { %p1237_p2 = por %p1236_p1, %p1235_p0 }
  0x44   :  { %p1238_p3 = pnand %p1237_p2, %p1231_p13 }
  0x46   :  { %1241 = shalt.err (!%p1238_p3)
}
  0x47   :  { %108 = dma.hbm_to_vmem [thread:$0]  %s1699_s7, 4096, %s103_s20, [#allocation15], %s1433_s27, %s1433_s27, %s1434_s28  }
  0x48   :  { %s1242_s16 = scalar_lea.hbm %s1701_s9, 512 }
  0x49   :  { %p1243_p4 = scmp.ne.s32.totalorder %s1701_s9, %s1242_s16  ;;  %p1246_p5 = scmp.lt.u32.totalorder %s1242_s16, %s1701_s9 }
  0x4b   :  { %p1248_p6 = pnand %p1246_p5, %p1243_p4 }
  0x4d   :  { %1251 = shalt.err (!%p1248_p6)
}
  0x4e   :  { %s1252_s21 = scalar_lea.vmem %s127_s22, 512  ;;  %p1257_p8 = scmp.lt.s32.totalorder %s127_s22, %s127_s22 }
  0x4f   :  { %p1253_p7 = scmp.ne.s32.totalorder %s127_s22, %s1252_s21  ;;  %p1258_p9 = scmp.lt.s32.totalorder %s1252_s21, %s1252_s21 }
  0x51   :  { %p1259_p10 = por %p1258_p9, %p1257_p8 }
  0x53   :  { %p1260_p11 = pnand %p1259_p10, %p1253_p7 }
  0x55   :  { %1263 = shalt.err (!%p1260_p11)
}
  0x56   :  { %s1439_s7 = smov 256   ;;  %s1440_s20 = smov 16  }
  0x57   :  { %132 = dma.hbm_to_vmem [thread:$0]  %s1701_s9, 512, %s127_s22, [#allocation18], %s1439_s7, %s1439_s7, %s1440_s20  }
  0x58   :  { %s1441_s18 = smov [#allocation2]   ;;  %s1442_s25 = smov [#allocation7]  }
  0x59   :  { %s29_s24 = sshll.u32 %s1441_s18, 4  ;;  %s50_s26 = sshll.u32 %s1442_s25, 4  ;;  %s30_s24 = int_to_ptr.vmem [resolvable:$true] %s29_s24  ;;  %s51_s26 = int_to_ptr.vmem [resolvable:$true] %s50_s26 }
  0x5a   :  { %s1264_s15 = scalar_lea.hbm %s1692_s0, 256 }
  0x5b   :  { %p1265_p12 = scmp.ne.s32.totalorder %s1692_s0, %s1264_s15  ;;  %p1268_p13 = scmp.lt.u32.totalorder %s1264_s15, %s1692_s0 }
  0x5d   :  { %p1270_p0 = pnand %p1268_p13, %p1265_p12 }
  0x5f   :  { %1273 = shalt.err (!%p1270_p0)
}
  0x60   :  { %s1274_s9 = scalar_lea.vmem %s30_s24, 256  ;;  %p1279_p2 = scmp.lt.s32.totalorder %s30_s24, %s30_s24 }
  0x61   :  { %p1275_p1 = scmp.ne.s32.totalorder %s30_s24, %s1274_s9  ;;  %p1280_p3 = scmp.lt.s32.totalorder %s1274_s9, %s1274_s9 }
  0x63   :  { %p1281_p4 = por %p1280_p3, %p1279_p2 }
  0x65   :  { %p1282_p5 = pnand %p1281_p4, %p1275_p1 }
  0x67   :  { %1285 = shalt.err (!%p1282_p5)
}
  0x68   :  { %32 = dma.hbm_to_vmem [thread:$0]  %s1692_s0, 256, %s30_s24, [#allocation3]  }
  0x69   :  { %s1286_s19 = scalar_lea.hbm %s1694_s2, 256 }
  0x6a   :  { %p1287_p6 = scmp.ne.s32.totalorder %s1694_s2, %s1286_s19  ;;  %p1290_p7 = scmp.lt.u32.totalorder %s1286_s19, %s1694_s2 }
  0x6c   :  { %p1292_p8 = pnand %p1290_p7, %p1287_p6 }
  0x6e   :  { %1295 = shalt.err (!%p1292_p8)
}
  0x6f   :  { %s1296_s25 = scalar_lea.vmem %s51_s26, 256  ;;  %p1301_p10 = scmp.lt.s32.totalorder %s51_s26, %s51_s26 }
  0x70   :  { %p1297_p9 = scmp.ne.s32.totalorder %s51_s26, %s1296_s25  ;;  %p1302_p11 = scmp.lt.s32.totalorder %s1296_s25, %s1296_s25 }
  0x72   :  { %p1303_p12 = por %p1302_p11, %p1301_p10 }
  0x74   :  { %p1304_p13 = pnand %p1303_p12, %p1297_p9 }
  0x76   :  { %1307 = shalt.err (!%p1304_p13)
}
  0x77   :  { %56 = dma.hbm_to_vmem [thread:$0]  %s1694_s2, 256, %s51_s26, [#allocation6], %s1433_s27, %s1433_s27, %s1434_s28  }
  0x78   :  { %s1443_s29 = smov [#allocation10]   ;;  %s1444_s15 = smov [#allocation13]  }
  0x79   :  { %s73_s5 = sshll.u32 %s1443_s29, 4  ;;  %s93_s30 = sshll.u32 %s1444_s15, 4  ;;  %s74_s5 = int_to_ptr.vmem [resolvable:$true] %s73_s5  ;;  %s94_s30 = int_to_ptr.vmem [resolvable:$true] %s93_s30 }
  0x7a   :  { %s1308_s16 = scalar_lea.hbm %s1696_s4, 128 }
  0x7b   :  { %p1309_p0 = scmp.ne.s32.totalorder %s1696_s4, %s1308_s16  ;;  %p1312_p1 = scmp.lt.u32.totalorder %s1308_s16, %s1696_s4 }
  0x7d   :  { %p1314_p2 = pnand %p1312_p1, %p1309_p0 }
  0x7f   :  { %1317 = shalt.err (!%p1314_p2)
}
  0x80   :  { %s1318_s2 = scalar_lea.vmem %s74_s5, 128  ;;  %p1323_p4 = scmp.lt.s32.totalorder %s74_s5, %s74_s5 }
  0x81   :  { %p1319_p3 = scmp.ne.s32.totalorder %s74_s5, %s1318_s2  ;;  %p1324_p5 = scmp.lt.s32.totalorder %s1318_s2, %s1318_s2 }
  0x83   :  { %p1325_p6 = por %p1324_p5, %p1323_p4 }
  0x85   :  { %p1326_p7 = pnand %p1325_p6, %p1319_p3 }
  0x87   :  { %1329 = shalt.err (!%p1326_p7)
}
  0x88   :  { %76 = dma.hbm_to_vmem [thread:$0]  %s1696_s4, 128, %s74_s5, [#allocation9]  }
  0x89   :  { %s1330_s23 = scalar_lea.hbm %s1698_s6, 128 }
  0x8a   :  { %p1331_p8 = scmp.ne.s32.totalorder %s1698_s6, %s1330_s23  ;;  %p1334_p9 = scmp.lt.u32.totalorder %s1330_s23, %s1698_s6 }
  0x8c   :  { %p1336_p10 = pnand %p1334_p9, %p1331_p8 }
  0x8e   :  { %1339 = shalt.err (!%p1336_p10)
}
  0x8f   :  { %s1340_s24 = scalar_lea.vmem %s94_s30, 128  ;;  %p1345_p12 = scmp.lt.s32.totalorder %s94_s30, %s94_s30 }
  0x90   :  { %p1341_p11 = scmp.ne.s32.totalorder %s94_s30, %s1340_s24  ;;  %p1346_p13 = scmp.lt.s32.totalorder %s1340_s24, %s1340_s24 }
  0x92   :  { %p1347_p0 = por %p1346_p13, %p1345_p12 }
  0x94   :  { %p1348_p1 = pnand %p1347_p0, %p1341_p11 }
  0x96   :  { %1351 = shalt.err (!%p1348_p1)
}
  0x97   :  { %96 = dma.hbm_to_vmem [thread:$0]  %s1698_s6, 128, %s94_s30, [#allocation12]  }
  0x98   :  { %s1445_s5 = smov [#allocation16]   ;;  %s1446_s12 = smov [#allocation19]  }
  0x99   :  { %s114_s15 = sshll.u32 %s1445_s5, 4  ;;  %s138_s14 = sshll.u32 %s1446_s12, 4  ;;  %s115_s15 = int_to_ptr.vmem [resolvable:$true] %s114_s15  ;;  %s139_s14 = int_to_ptr.vmem [resolvable:$true] %s138_s14 }
  0x9a   :  { %s1352_s22 = scalar_lea.hbm %s1700_s8, 4096 }
  0x9b   :  { %p1353_p2 = scmp.ne.s32.totalorder %s1700_s8, %s1352_s22  ;;  %p1356_p3 = scmp.lt.u32.totalorder %s1352_s22, %s1700_s8 }
  0x9d   :  { %p1358_p4 = pnand %p1356_p3, %p1353_p2 }
  0x9f   :  { %1361 = shalt.err (!%p1358_p4)
}
  0xa0   :  { %s1362_s6 = scalar_lea.vmem %s115_s15, 4096  ;;  %p1367_p6 = scmp.lt.s32.totalorder %s115_s15, %s115_s15 }
  0xa1   :  { %p1363_p5 = scmp.ne.s32.totalorder %s115_s15, %s1362_s6  ;;  %p1368_p7 = scmp.lt.s32.totalorder %s1362_s6, %s1362_s6 }
  0xa3   :  { %p1369_p8 = por %p1368_p7, %p1367_p6 }
  0xa5   :  { %p1370_p9 = pnand %p1369_p8, %p1363_p5 }
  0xa7   :  { %1373 = shalt.err (!%p1370_p9)
}
  0xa8   :  { %120 = dma.hbm_to_vmem [thread:$0]  %s1700_s8, 4096, %s115_s15, [#allocation15], %s1433_s27, %s1433_s27, %s1434_s28  }
  0xa9   :  { %s1374_s23 = scalar_lea.hbm %s1702_s10, 512 }
  0xaa   :  { %p1375_p10 = scmp.ne.s32.totalorder %s1702_s10, %s1374_s23  ;;  %p1378_p11 = scmp.lt.u32.totalorder %s1374_s23, %s1702_s10 }
  0xac   :  { %p1380_p12 = pnand %p1378_p11, %p1375_p10 }
  0xae   :  { %1383 = shalt.err (!%p1380_p12)
}
  0xaf   :  { %s1384_s24 = scalar_lea.vmem %s139_s14, 512  ;;  %p1389_p0 = scmp.lt.s32.totalorder %s139_s14, %s139_s14 }
  0xb0   :  { %p1385_p13 = scmp.ne.s32.totalorder %s139_s14, %s1384_s24  ;;  %p1390_p1 = scmp.lt.s32.totalorder %s1384_s24, %s1384_s24 }
  0xb2   :  { %p1391_p2 = por %p1390_p1, %p1389_p0 }
  0xb4   :  { %p1392_p3 = pnand %p1391_p2, %p1385_p13 }
  0xb6   :  { %1395 = shalt.err (!%p1392_p3)
}
  0xb7   :  { %144 = dma.hbm_to_vmem [thread:$0]  %s1702_s10, 512, %s139_s14, [#allocation18], %s1439_s7, %s1439_s7, %s1440_s20  }
  0xb8   :  { %1418 = dma.done.wait [#allocation3], 256  }
  0xb9   :  { %1419 = vsyncadd [#allocation3], 4294967040 }
  0xba   :  { %1420 = dma.done.wait [#allocation6], 512  }
  0xbb   :  { %1421 = vsyncadd [#allocation6], 4294966784 }
  0xbc   :  { %1422 = dma.done.wait [#allocation9], 256  }
  0xbd   :  { %1423 = vsyncadd [#allocation9], 4294967040 }
  0xbe   :  { %1424 = dma.done.wait [#allocation12], 256  }
  0xbf   :  { %1425 = vsyncadd [#allocation12], 4294967040 }
  0xc0   :  { %1426 = dma.done.wait [#allocation15], 8192  }
  0xc1   :  { %1427 = vsyncadd [#allocation15], 4294959104 }
  0xc2   :  { %1428 = dma.done.wait [#allocation18], 1024  }
  0xc3   :  { %1429 = vsyncadd [#allocation18], 4294966272  ;;  %v196_v0 = vld [vmem:[#allocation14 + $0x80] sm:$0xff]  ;;  %v197_v1 = vld [vmem:[#allocation14 + $0x88] sm:$0xff]  ;;  %vm398_vm0 = vcmask 64512   ;;  %vm1449_vm1 = vmmov 0  }
  0xc4   :  { %v298_v2 = vld [vmem:[#allocation16 + $0x80] sm:$0xff]  ;;  %v1046_v3 = vpack.c.bf16 %v197_v1, %v196_v0  ;;  %v299_v4 = vld [vmem:[#allocation16 + $0x88] sm:$0xff]  ;;  %v198_v11 = vld [vmem:[#allocation14 + $0x90] sm:$0xff]  ;;  %vm582_vm2 = vcmask 130048   ;;  %s1451_s10 = smov [#allocation20]  }
  0xc5   :  { %v180_v5 = vld [vmem:[#allocation14] sm:$0xff]  ;;  %v181_v6 = vld [vmem:[#allocation14 + $0x8] sm:$0xff]  ;;  %v1078_v7 = vpack.c.bf16 %v299_v4, %v298_v2  ;;  %v199_v13 = vld [vmem:[#allocation14 + $0x98] sm:$0xff]  ;;  %s916_s28 = sshll.u32 %s1451_s10, 4  ;;  %s917_s28 = int_to_ptr.vmem [resolvable:$true] %s916_s28 }
  0xc6   :  { %v1048_v8 = vpack.c.bf16 %v181_v6, %v180_v5  ;;  %v282_v9 = vld [vmem:[#allocation16] sm:$0xff]  ;;  %v283_v10 = vld [vmem:[#allocation16 + $0x8] sm:$0xff]  ;;  %1047 = vmatprep.subr.bf16.mxu0 %v1046_v3  ;;  %v300_v14 = vld [vmem:[#allocation16 + $0x90] sm:$0xff]  ;;  %v1050_v16 = vpack.c.bf16 %v199_v13, %v198_v11  ;;  %s1396_s7 = scalar_lea.vmem %s917_s28, 256  ;;  %p1401_p5 = scmp.lt.s32.totalorder %s917_s28, %s917_s28 }
  0xc7   :  { %v1080_v12 = vpack.c.bf16 %v283_v10, %v282_v9  ;;  %v301_v15 = vld [vmem:[#allocation16 + $0x98] sm:$0xff]  ;;  %1079 = vmatprep.subr.bf16.mxu1 %v1078_v7  ;;  %v182_v18 = vld [vmem:[#allocation14 + $0x10] sm:$0xff]  ;;  %v200_v23 = vld [vmem:[#allocation14 + $0xa0] sm:$0xff]  ;;  %p1397_p4 = scmp.ne.s32.totalorder %s917_s28, %s1396_s7  ;;  %p1402_p6 = scmp.lt.s32.totalorder %s1396_s7, %s1396_s7 }
  0xc8   :  { %1049 = vmatpush3.bf16.msra.mxu0 %v1048_v8  ;;  %v1082_v17 = vpack.c.bf16 %v301_v15, %v300_v14  ;;  %v183_v19 = vld [vmem:[#allocation14 + $0x18] sm:$0xff]  ;;  %v284_v20 = vld [vmem:[#allocation16 + $0x10] sm:$0xff]  ;;  %v201_v24 = vld [vmem:[#allocation14 + $0xa8] sm:$0xff] }
  0xc9   :  { %1081 = vmatpush3.bf16.msra.mxu1 %v1080_v12  ;;  %v1052_v21 = vpack.c.bf16 %v183_v19, %v182_v18  ;;  %v285_v22 = vld [vmem:[#allocation16 + $0x18] sm:$0xff]  ;;  %1051 = vmatprep.subr.bf16.mxu0 %v1050_v16  ;;  %v1054_v26 = vpack.c.bf16 %v201_v24, %v200_v23  ;;  %v302_v27 = vld [vmem:[#allocation16 + $0xa0] sm:$0xff]  ;;  %v303_v28 = vld [vmem:[#allocation16 + $0xa8] sm:$0xff]  ;;  %p1403_p7 = por %p1402_p6, %p1401_p5 }
  0xca   :  { %1083 = vmatprep.subr.bf16.mxu1 %v1082_v17  ;;  %v1084_v25 = vpack.c.bf16 %v285_v22, %v284_v20  ;;  %v184_v29 = vld [vmem:[#allocation14 + $0x20] sm:$0xff]  ;;  %v1086_v30 = vpack.c.bf16 %v303_v28, %v302_v27  ;;  %v185_v31 = vld [vmem:[#allocation14 + $0x28] sm:$0xff]  ;;  %v202_v35 = vld [vmem:[#allocation14 + $0xb0] sm:$0xff] }
  0xcb   :  { %v286_v32 = vld [vmem:[#allocation16 + $0x20] sm:$0xff]  ;;  %v287_v33 = vld [vmem:[#allocation16 + $0x28] sm:$0xff]  ;;  %v1056_v34 = vpack.c.bf16 %v185_v31, %v184_v29  ;;  %v203_v36 = vld [vmem:[#allocation14 + $0xb8] sm:$0xff]  ;;  %p1404_p8 = pnand %p1403_p7, %p1397_p4 }
  0xcc   :  { %1053 = vmatpush3.bf16.msra.mxu0 %v1052_v21  ;;  %v304_v37 = vld [vmem:[#allocation16 + $0xb0] sm:$0xff]  ;;  %v1088_v38 = vpack.c.bf16 %v287_v33, %v286_v32  ;;  %v1058_v39 = vpack.c.bf16 %v203_v36, %v202_v35  ;;  %v305_v40 = vld [vmem:[#allocation16 + $0xb8] sm:$0xff]  ;;  %v204_v46 = vld [vmem:[#allocation14 + $0xc0] sm:$0xff]  ;;  %v1447_v36 = vmov 0  }
  0xcd   :  { %1085 = vmatpush3.bf16.msra.mxu1 %v1084_v25  ;;  %1055 = vmatprep.subr.bf16.mxu0 %v1054_v26  ;;  %v186_v41 = vld [vmem:[#allocation14 + $0x30] sm:$0xff]  ;;  %v187_v42 = vld [vmem:[#allocation14 + $0x38] sm:$0xff]  ;;  %v1090_v43 = vpack.c.bf16 %v305_v40, %v304_v37  ;;  %v205_v47 = vld [vmem:[#allocation14 + $0xc8] sm:$0xff] }
  0xce   :  { %1087 = vmatprep.subr.bf16.mxu1 %v1086_v30  ;;  %v288_v44 = vld [vmem:[#allocation16 + $0x30] sm:$0xff]  ;;  %v289_v45 = vld [vmem:[#allocation16 + $0x38] sm:$0xff]  ;;  %v306_v48 = vld [vmem:[#allocation16 + $0xc0] sm:$0xff]  ;;  %v1060_v50 = vpack.c.bf16 %v187_v42, %v186_v41  ;;  %v1062_v52 = vpack.c.bf16 %v205_v47, %v204_v46  ;;  %1144 = vset.pattern.permute.xlu0 %v1447_v36  ;;  %v1450_v46 = vmov 0.0  }
  0xcf   :  { %v307_v49 = vld [vmem:[#allocation16 + $0xc8] sm:$0xff]  ;;  %v1092_v51 = vpack.c.bf16 %v289_v45, %v288_v44  ;;  %v188_v53 = vld [vmem:[#allocation14 + $0x40] sm:$0xff]  ;;  %v206_v58 = vld [vmem:[#allocation14 + $0xd0] sm:$0xff]  ;;  %1145 = vset.pattern.permute.xlu1 %v1447_v36  ;;  %v1448_v45 = vmov 0.0|0.0  }
  0xd0   :  { %1057 = vmatpush3.bf16.msra.mxu0 %v1056_v34  ;;  %v189_v54 = vld [vmem:[#allocation14 + $0x48] sm:$0xff]  ;;  %v290_v55 = vld [vmem:[#allocation16 + $0x40] sm:$0xff]  ;;  %v1094_v56 = vpack.c.bf16 %v307_v49, %v306_v48  ;;  %v207_v59 = vld [vmem:[#allocation14 + $0xd8] sm:$0xff] }
  0xd1   :  { %1089 = vmatpush3.bf16.msra.mxu1 %v1088_v38  ;;  %1059 = vmatprep.subr.bf16.mxu0 %v1058_v39  ;;  %v291_v57 = vld [vmem:[#allocation16 + $0x48] sm:$0xff]  ;;  %v308_v60 = vld [vmem:[#allocation16 + $0xd0] sm:$0xff]  ;;  %v309_v61 = vld [vmem:[#allocation16 + $0xd8] sm:$0xff]  ;;  %v1064_v62 = vpack.c.bf16 %v189_v54, %v188_v53  ;;  %v1066_v0 = vpack.c.bf16 %v207_v59, %v206_v58 }
  0xd2   :  { %1091 = vmatprep.subr.bf16.mxu1 %v1090_v43  ;;  %v1096_v63 = vpack.c.bf16 %v291_v57, %v290_v55  ;;  %v190_v1 = vld [vmem:[#allocation14 + $0x50] sm:$0xff]  ;;  %v191_v2 = vld [vmem:[#allocation14 + $0x58] sm:$0xff]  ;;  %v1098_v4 = vpack.c.bf16 %v309_v61, %v308_v60  ;;  %v208_v6 = vld [vmem:[#allocation14 + $0xe0] sm:$0xff] }
  0xd3   :  { %v292_v3 = vld [vmem:[#allocation16 + $0x50] sm:$0xff]  ;;  %v293_v5 = vld [vmem:[#allocation16 + $0x58] sm:$0xff]  ;;  %v209_v7 = vld [vmem:[#allocation14 + $0xe8] sm:$0xff]  ;;  %v1068_v10 = vpack.c.bf16 %v191_v2, %v190_v1 }
  0xd4   :  { %1061 = vmatpush3.bf16.msra.mxu0 %v1060_v50  ;;  %v310_v8 = vld [vmem:[#allocation16 + $0xe0] sm:$0xff]  ;;  %v311_v9 = vld [vmem:[#allocation16 + $0xe8] sm:$0xff]  ;;  %v1100_v12 = vpack.c.bf16 %v293_v5, %v292_v3  ;;  %v1070_v13 = vpack.c.bf16 %v209_v7, %v208_v6  ;;  %v1662_v16 = vld [vmem:[#allocation2 + $0x8] sm:$0xff] }
  0xd5   :  { %1093 = vmatpush3.bf16.msra.mxu1 %v1092_v51  ;;  %1063 = vmatprep.subr.bf16.mxu0 %v1062_v52  ;;  %v192_v11 = vld [vmem:[#allocation14 + $0x60] sm:$0xff]  ;;  %v193_v14 = vld [vmem:[#allocation14 + $0x68] sm:$0xff]  ;;  %v1102_v17 = vpack.c.bf16 %v311_v9, %v310_v8  ;;  %v210_v19 = vld [vmem:[#allocation14 + $0xf0] sm:$0xff] }
  0xd6   :  { %1095 = vmatprep.subr.bf16.mxu1 %v1094_v56  ;;  %v294_v15 = vld [vmem:[#allocation16 + $0x60] sm:$0xff]  ;;  %v295_v18 = vld [vmem:[#allocation16 + $0x68] sm:$0xff]  ;;  %v211_v20 = vld [vmem:[#allocation14 + $0xf8] sm:$0xff]  ;;  %276 = vmatprep.mubr.f32.mxu0 %v1662_v16  ;;  %v1072_v23 = vpack.c.bf16 %v193_v14, %v192_v11 }
  0xd7   :  { %v312_v21 = vld [vmem:[#allocation16 + $0xf0] sm:$0xff]  ;;  %v313_v22 = vld [vmem:[#allocation16 + $0xf8] sm:$0xff]  ;;  %378 = vmatprep.mubr.f32.mxu1 %v1662_v16  ;;  %v1104_v24 = vpack.c.bf16 %v295_v18, %v294_v15  ;;  %v1074_v25 = vpack.c.bf16 %v211_v20, %v210_v19  ;;  %v384_v34 = vld [vmem:[#allocation5] sm:$0xff] }
  0xd8   :  { %1065 = vmatpush3.bf16.msra.mxu0 %v1064_v62  ;;  %v194_v26 = vld [vmem:[#allocation14 + $0x70] sm:$0xff]  ;;  %v195_v27 = vld [vmem:[#allocation14 + $0x78] sm:$0xff]  ;;  %v1106_v28 = vpack.c.bf16 %v313_v22, %v312_v21  ;;  %v385_v44 = vld [vmem:[#allocation5 + $0x8] sm:$0xff] }
  0xd9   :  { %1097 = vmatpush3.bf16.msra.mxu1 %v1096_v63  ;;  %1067 = vmatprep.subr.bf16.mxu0 %v1066_v0  ;;  %v296_v29 = vld [vmem:[#allocation16 + $0x70] sm:$0xff]  ;;  %v297_v30 = vld [vmem:[#allocation16 + $0x78] sm:$0xff]  ;;  %v1076_v31 = vpack.c.bf16 %v195_v27, %v194_v26  ;;  %v576_v47 = vld [vmem:[#allocation10] sm:$0xff] }
  0xda   :  { %1099 = vmatprep.subr.bf16.mxu1 %v1098_v4  ;;  %v1108_v32 = vpack.c.bf16 %v297_v30, %v296_v29  ;;  %v1666_v33 = vld [vmem:[#allocation2] sm:$0xff]  ;;  %v387_v37 = vld [vmem:[#allocation7 + $0x8] sm:$0xff]  ;;  %579 = vperm.xlu1 %1145, %v576_v47   ;;  %v575_v18 = vld [vmem:[#allocation8] sm:$0xff] }
  0xdb   :  { %v386_v35 = vld [vmem:[#allocation7] sm:$0xff]  ;;  %v663_v48 = vld [vmem:[#allocation13] sm:$0xff]  ;;  %v749_v20 = vld [vmem:[#allocation17 + $0x8] sm:$0xff] }
  0xdc   :  { %1069 = vmatpush3.bf16.msra.mxu0 %v1068_v10  ;;  %390 = vperm.xlu0 %1144, %v386_v35   ;;  %v662_v19 = vld [vmem:[#allocation11] sm:$0xff]  ;;  %v751_v21 = vld [vmem:[#allocation17 + $0x18] sm:$0xff]  ;;  %v827_v22 = vld [vmem:[#allocation19 + $0x8] sm:$0xff] }
  0xdd   :  { %1101 = vmatpush3.bf16.msra.mxu1 %v1100_v12  ;;  %1071 = vmatprep.subr.bf16.mxu0 %v1070_v13  ;;  %v750_v26 = vld [vmem:[#allocation17 + $0x10] sm:$0xff]  ;;  %v826_v29 = vld [vmem:[#allocation19] sm:$0xff] }
  0xde   :  { %1103 = vmatprep.subr.bf16.mxu1 %v1102_v17  ;;  %666 = vperm.xlu1 %1145, %v663_v48   ;;  %v828_v30 = vld [vmem:[#allocation19 + $0x10] sm:$0xff] }
  0xe0   :  { %1073 = vmatpush3.bf16.msra.mxu0 %v1072_v23  ;;  %395 = vperm.xlu0 %1144, %v387_v37   ;;  %v1116_v23 = vpack.c.bf16 %v751_v21, %v749_v20 }
  0xe1   :  { %1105 = vmatpush3.bf16.msra.mxu1 %v1104_v24  ;;  %1075 = vmatprep.subr.bf16.mxu0 %v1074_v25  ;;  %v829_v24 = vld [vmem:[#allocation19 + $0x18] sm:$0xff]  ;;  %v748_v25 = vld [vmem:[#allocation17] sm:$0xff] }
  0xe2   :  { %1107 = vmatprep.subr.bf16.mxu1 %v1106_v28  ;;  %v1120_v27 = vpack.c.bf16 %v829_v24, %v827_v22  ;;  %v1118_v28 = vpack.c.bf16 %v750_v26, %v748_v25 }
  0xe4   :  { %1077 = vmatpush3.bf16.msra.mxu0 %v1076_v31  ;;  %v1122_v31 = vpack.c.bf16 %v828_v30, %v826_v29 }
  0xe5   :  { %1109 = vmatpush3.bf16.msra.mxu1 %v1108_v32 }
  0xe7   :  { %277 = vmatmul.mubr.f32.vlgmr.msra.gmra.mrb[0].mxu0 %v1666_v33 }
  0xe8   :  { %379 = vmatmul.mubr.f32.vlgmr.msra.gmra.mrb[0].mxu1 %v1666_v33  ;;  %1024 = vmatprep.mubr.msk.f32.mxu0 %vm398_vm0, %v384_v34 }
  0xe9   :  { %1029 = vmatprep.mubr.msk.f32.mxu1 %vm398_vm0, %v384_v34 }
 0x159   :  { %v580_v32 = vpop.permute.xlu1 %579 }
 0x15b   :  { %v391_v49 = vpop.permute.xlu0 %390 }
 0x15d   :  { %v667_v34 = vpop.permute.xlu1 %666 }
 0x15f   :  { %v396_v50 = vpop.permute.xlu0 %395 }
 0x1ba   :  { %v972_v38 = vpop.f32.mrb[0].mxu0 }
 0x1bb   :  { %v1007_v39 = vpop.f32.mrb[0].mxu1  ;;  %v973_v40 = vpop.f32.mrb[1].mxu0 }
 0x1bc   :  { %v974_v41 = vadd.f32 %v973_v40, %v972_v38  ;;  %v1008_v42 = vpop.f32.mrb[1].mxu1 }
 0x1bd   :  { %v1009_v43 = vadd.f32 %v1008_v42, %v1007_v39 }
 0x1be   :  { %1022 = vmatprep.subr.mxu0 %v974_v41 }
 0x1bf   :  { %1027 = vmatprep.subr.mxu1 %v1009_v43  ;;  %1023 = vmatpush3.msra.mxu0 %v974_v41 }
 0x1c0   :  { %1028 = vmatpush3.msra.mxu1 %v1009_v43  ;;  %1025 = vmatmul.mubr.msk.f32.vlgmr.msra.gmra.mrb[2].mxu0 %vm398_vm0, %v385_v44 }
 0x1c1   :  { %1030 = vmatmul.mubr.msk.f32.vlgmr.msra.gmra.mrb[2].mxu1 %vm398_vm0, %v385_v44  ;;  %1110 = vmatprep.subr.bf16.mxu0 %v1448_v45 }
 0x1c2   :  { %1113 = vmatprep.subr.bf16.mxu1 %v1448_v45  ;;  %1036 = vmatprep.mubr.msk.f32.mxu0 %vm1449_vm1, %v1450_v46 }
 0x1c3   :  { %1043 = vmatprep.mubr.msk.f32.mxu1 %vm1449_vm1, %v1450_v46 }
 0x293   :  { %v1026_v51 = vpop.f32.mrb[2].mxu0 }
 0x294   :  { %v477_v52 = vadd.f32 %v1026_v51, %v396_v50  ;;  %v1031_v53 = vpop.f32.mrb[2].mxu1  ;;  %v471_v54 = vpop.f32.mrb[3].mxu0 }
 0x295   :  { %v552_v55 = vadd.f32 %v1031_v53, %v396_v50  ;;  %v472_v56 = vadd.f32 %v471_v54, %v391_v49  ;;  %v546_v57 = vpop.f32.mrb[3].mxu1 }
 0x296   :  { %v556_v58 = vadd.f32 3.0, %v477_v52  ;;  %v547_v59 = vadd.f32 %v546_v57, %v391_v49 }
 0x297   :  { %v566_v60 = vadd.f32 3.0, %v552_v55  ;;  %v555_v61 = vadd.f32 3.0, %v472_v56 }
 0x298   :  { %v558_v62 = vmax.f32 %v556_v58, 0.0  ;;  %v565_v63 = vadd.f32 3.0, %v547_v59 }
 0x299   :  { %v568_v0 = vmax.f32 %v566_v60, 0.0  ;;  %v557_v1 = vmax.f32 %v555_v61, 0.0 }
 0x29a   :  { %v560_v2 = vmin.f32 %v558_v62, 6.0  ;;  %v567_v3 = vmax.f32 %v565_v63, 0.0 }
 0x29b   :  { %v570_v4 = vmin.f32 %v568_v0, 6.0  ;;  %v559_v5 = vmin.f32 %v557_v1, 6.0 }
 0x29c   :  { %v562_v6 = vmul.f32 %v560_v2, %v477_v52  ;;  %v569_v7 = vmin.f32 %v567_v3, 6.0 }
 0x29d   :  { %v572_v8 = vmul.f32 %v570_v4, %v552_v55  ;;  %v561_v9 = vmul.f32 %v559_v5, %v472_v56 }
 0x29e   :  { %v564_v10 = vmul.f32 0.16666667, %v562_v6  ;;  %v571_v11 = vmul.f32 %v569_v7, %v547_v59 }
 0x29f   :  { %v574_v12 = vmul.f32 0.16666667, %v572_v8  ;;  %v563_v13 = vmul.f32 0.16666667, %v561_v9 }
 0x2a0   :  { %v573_v14 = vmul.f32 0.16666667, %v571_v11 }
 0x2a1   :  { %v1111_v15 = vpack.c.bf16 %v564_v10, %v563_v13 }
 0x2a2   :  { %v1114_v17 = vpack.c.bf16 %v574_v12, %v573_v14 }
 0x2a3   :  { %1112 = vmatpush3.bf16.msra.mxu0 %v1111_v15 }
 0x2a4   :  { %1115 = vmatpush3.bf16.msra.mxu1 %v1114_v17  ;;  %1117 = vmatprep.subr.bf16.mxu0 %v1116_v23 }
 0x2a5   :  { %1121 = vmatprep.subr.bf16.mxu1 %v1120_v27 }
 0x2a6   :  { %1037 = vmatmul.mubr.msk.f32.vlgmr.msra.gmra.mrb[4].mxu0 %vm582_vm2, %v575_v18 }
 0x2a7   :  { %1044 = vmatmul.mubr.msk.f32.vlgmr.msra.gmra.mrb[4].mxu1 %vm582_vm2, %v662_v19  ;;  %819 = vmatprep.mubr.f32.mxu0 %v1450_v46 }
 0x2a8   :  { %897 = vmatprep.mubr.f32.mxu1 %v1450_v46  ;;  %1119 = vmatpush1.bf16.msra.mxu0 %v1118_v28 }
 0x2a9   :  { %1123 = vmatpush1.bf16.msra.mxu1 %v1122_v31 }
 0x379   :  { %v652_v35 = vpop.f32.mrb[4].mxu0 }
 0x37a   :  { %v653_v36 = vadd.f32 %v652_v35, %v580_v32  ;;  %v738_v37 = vpop.f32.mrb[4].mxu1  ;;  %v1038_v38 = vpop.f32.mrb[5].mxu0 }
 0x37b   :  { %v739_v39 = vadd.f32 %v738_v37, %v667_v34  ;;  %v1045_v40 = vpop.f32.mrb[5].mxu1 }
 0x37c   :  { %v935_v41 = vmul.f32 -1.442695, %v653_v36 }
 0x37d   :  { %v937_v42 = vmul.f32 -1.442695, %v739_v39 }
 0x37e   :  { %1146 = vpow2.f32 %v935_v41 }
 0x37f   :  { %1148 = vpow2.f32 %v937_v42 }
 0x388   :  { %v1147_v43 = vpop.eup %1146 }
 0x389   :  { %v1149_v44 = vpop.eup %1148  ;;  %v659_v45 = vadd.f32 1.0, %v1147_v43 }
 0x38a   :  { %v745_v46 = vadd.f32 1.0, %v1149_v44 }
 0x38b   :  { %1150 = vrcp.f32 %v659_v45 }
 0x38c   :  { %1152 = vrcp.f32 %v745_v46 }
 0x395   :  { %v1151_v47 = vpop.eup %1150 }
 0x396   :  { %v1153_v48 = vpop.eup %1152  ;;  %938 = vmatmul.mubr.msk.f32.vlgmr.msra.gmra.mrb[6].mxu0 %vm582_vm2, %v1151_v47 }
 0x397   :  { %939 = vmatmul.mubr.msk.f32.vlgmr.msra.gmra.mrb[6].mxu1 %vm582_vm2, %v1153_v48 }
 0x469   :  { %v821_v49 = vpop.f32.mrb[6].mxu0 }
 0x46a   :  { %v904_v50 = vmul.f32 %v821_v49, %v1666_v33  ;;  %v899_v51 = vpop.f32.mrb[6].mxu1  ;;  %v823_v52 = vpop.f32.mrb[7].mxu0 }
 0x46b   :  { %v905_v53 = vmul.f32 %v823_v52, %v1662_v16  ;;  %v901_v54 = vpop.f32.mrb[7].mxu1 }
 0x46c   :  { %v906_v55 = vmul.f32 %v904_v50, %v899_v51 }
 0x46d   :  { %v907_v56 = vmul.f32 %v905_v53, %v901_v54 }
 0x46e   :  { %908 = vst [vmem:[#allocation20] sm:$0xff] %v906_v55 }
 0x46f   :  { %909 = vst [vmem:[#allocation20 + $0x8] sm:$0xff] %v907_v56 }
 0x470   :  { %1407 = shalt.err (!%p1404_p8)
}
 0x471   :  { %s1408_s29 = scalar_lea.hbm %s1703_s11, 256 }
 0x472   :  { %p1409_p9 = scmp.ne.s32.totalorder %s1703_s11, %s1408_s29  ;;  %p1412_p10 = scmp.lt.u32.totalorder %s1408_s29, %s1703_s11 }
 0x474   :  { %p1414_p11 = pnand %p1412_p10, %p1409_p9 }
 0x476   :  { %1417 = shalt.err (!%p1414_p11)
}
 0x477   :  { %919 = dma.vmem_to_hbm [thread:$0]  %s917_s28, 256, %s1703_s11, [#allocation4]  }
 0x478   :  { %1430 = dma.done.wait [#allocation4], 256  }
 0x479   :  { %1431 = vsyncadd [#allocation4], 4294967040 }
 0x47a   :  { %923 = vsyncpa [#allocation3], 1 }
 0x47b   :  { %924 = vsyncpa [#allocation6], 1 }
 0x47c   :  { %925 = vsyncpa [#allocation9], 1 }
 0x47d   :  { %926 = vsyncpa [#allocation12], 1 }
 0x47e   :  { %927 = vsyncpa [#allocation15], 1 }
 0x47f   :  { %928 = vsyncpa [#allocation18], 1 }
 0x480   :  { %929 = vsyncpa [#allocation4], 1 }

</bundles_post_ra>
